<compile_context>
chip_gen: v6e
topology: v6e:2x2x1
jax: 0.10.0
libtpu: 0.0.40
codegen_flags: <defaults>
</compile_context>

<pallas_src>
import jax
import jax.numpy as jnp
from jax.experimental import pallas as pl
from jax.experimental.pallas import tpu as pltpu


_SQRT_HALF = 0.7071067811865476


def _round_up(x: int, m: int) -> int:
    return ((x + m - 1) // m) * m


def _erf_poly(z):
    """erf(z), Abramowitz & Stegun 7.1.26 (max abs error ~1.5e-7), f32 math."""
    a1, a2, a3, a4, a5 = (0.254829592, -0.284496736, 1.421413741,
                          -1.453152027, 1.061405429)
    p = 0.3275911
    az = jnp.abs(z)
    t = 1.0 / (1.0 + p * az)
    poly = ((((a5 * t + a4) * t + a3) * t + a2) * t + a1) * t
    y = 1.0 - poly * jnp.exp(-az * az)          # exp -> EUP slot, rest -> VPU
    return jnp.where(z >= 0, y, -y)


def _gelu_exact(h):
    """Exact GELU (erf form), same as torch.nn.GELU() default."""
    return 0.5 * h * (1.0 + _erf_poly(h * _SQRT_HALF))


def _ffn_kernel(x_ref, w1_ref, b1_ref, w2_ref, b2_ref, o_ref):
    """One row-tile of the feed-forward block.

    x_ref:  [tm, dim]      (VMEM, tile of flattened tokens)
    w1_ref: [dim, hidden]  (VMEM, resident across grid)
    b1_ref: [1, hidden]    (VMEM, resident across grid)
    w2_ref: [hidden, dim]  (VMEM, resident across grid)
    b2_ref: [1, dim]       (VMEM, resident across grid)
    o_ref:  [tm, dim]      (VMEM)
    """
    x = x_ref[...]

    # First projection: MXU matmul with f32 accumulation, bias add in f32.
    h = jnp.dot(x, w1_ref[...], preferred_element_type=jnp.float32)
    h = h + b1_ref[...].astype(jnp.float32)

    # Exact GELU in f32 (VPU + one EUP exp).
    h = _gelu_exact(h)

    # Cast back to the weight dtype at the MXU boundary (bf16 stays bf16,
    # f32 is a no-op), accumulate the second projection in f32.
    h = h.astype(w2_ref.dtype)
    o = jnp.dot(h, w2_ref[...], preferred_element_type=jnp.float32)
    o = o + b2_ref[...].astype(jnp.float32)

    o_ref[...] = o.astype(o_ref.dtype)


def feedforward_forward(x, w1, b1, w2, b2, *, block_rows=256):
    """Pallas FeedForward matching the PyTorch module (dropout=0)."""
    B, N, dim = x.shape
    hidden = w1.shape[1]
    assert w1.shape == (dim, hidden)
    assert b1.shape == (1, hidden)
    assert w2.shape == (hidden, dim)
    assert b2.shape == (1, dim)

    # Flatten tokens to a single lane-dense row axis (layout plumbing only).
    M = B * N
    x2 = x.reshape(M, dim)

    # Row tile: multiple of 8 (sublane), capped by block_rows. Partial last
    # tiles are fine: rows are independent and OOB stores are masked.
    tm = min(block_rows, _round_up(M, 8))
    grid = (pl.cdiv(M, tm),)

    out = pl.pallas_call(
        _ffn_kernel,
        out_shape=jax.ShapeDtypeStruct((M, dim), x.dtype),
        grid_spec=pltpu.PrefetchScalarGridSpec(
            num_scalar_prefetch=0,
            grid=grid,
            in_specs=[
                pl.BlockSpec((tm, dim), lambda i: (i, 0)),        # x rows tile
                pl.BlockSpec((dim, hidden), lambda i: (0, 0)),    # w1 (resident)
                pl.BlockSpec((1, hidden), lambda i: (0, 0)),      # b1 (resident)
                pl.BlockSpec((hidden, dim), lambda i: (0, 0)),    # w2 (resident)
                pl.BlockSpec((1, dim), lambda i: (0, 0)),         # b2 (resident)
            ],
            out_specs=pl.BlockSpec((tm, dim), lambda i: (i, 0)),
        ),
        compiler_params=pltpu.CompilerParams(
            dimension_semantics=("parallel",)),
    )(x2, w1, b1, w2, b2)

    return out.reshape(B, N, dim)


def feedforward_reference(x, w1, b1, w2, b2):
    """Pure-JAX reference mirroring the PyTorch code (dropout=0, exact GELU)."""
    h = jnp.einsum("bnd,dh->bnh", x, w1) + b1[0]
    h = jax.nn.gelu(h, approximate=False)
    return jnp.einsum("bnh,hd->bnd", h, w2) + b2[0]


if __name__ == "__main__":
    # Small shapes consistent with the module: x [B, N, dim], hidden_dim.
    B, N, dim, hidden = 2, 8, 32, 64

    key = jax.random.PRNGKey(0)
    kx, k1, kb1, k2, kb2 = jax.random.split(key, 5)

    x = jax.random.normal(kx, (B, N, dim), dtype=jnp.float32)
    # Deterministic synthetic Linear weights, stored transposed (x @ W).
    w1 = jax.random.normal(k1, (dim, hidden), dtype=jnp.float32) * (dim ** -0.5)
    b1 = jax.random.normal(kb1, (1, hidden), dtype=jnp.float32) * 0.1
    w2 = jax.random.normal(k2, (hidden, dim), dtype=jnp.float32) * (hidden ** -0.5)
    b2 = jax.random.normal(kb2, (1, dim), dtype=jnp.float32) * 0.1

    out = feedforward_forward(x, w1, b1, w2, b2)
    out = jax.block_until_ready(out)

    ref = feedforward_reference(x, w1, b1, w2, b2)
    assert out.shape == (B, N, dim)
    max_err = jnp.max(jnp.abs(out - ref))
    assert jnp.allclose(out, ref, atol=1e-4, rtol=1e-4), f"max abs err {max_err}"

    print("KERNEL_OK")
</pallas_src>

<mosaic_0001>
module attributes {stable_mosaic.version = 11 : i64} {
  func.func @_ffn_kernel(%arg0: i32, %arg1: memref<16x32xf32, #tpu.memory_space<vmem>>, %arg2: memref<32x64xf32, #tpu.memory_space<vmem>>, %arg3: memref<1x64xf32, #tpu.memory_space<vmem>>, %arg4: memref<64x32xf32, #tpu.memory_space<vmem>>, %arg5: memref<1x32xf32, #tpu.memory_space<vmem>>, %arg6: memref<16x32xf32, #tpu.memory_space<vmem>>) attributes {dimension_semantics = [#tpu.dimension_semantics<parallel>], iteration_bounds = array<i64: 1>, scalar_prefetch = 0 : i64, scratch_operands = 0 : i64, tpu.core_type = #tpu.core_type<tc>, window_params = [{transform_indices = @transform_0, window_bounds = array<i64: 16, 32>}, {pipeline_mode = #tpu.pipeline_mode<synchronous>, transform_indices = @transform_1, window_bounds = array<i64: 32, 64>}, {pipeline_mode = #tpu.pipeline_mode<synchronous>, transform_indices = @transform_2, window_bounds = array<i64: 1, 64>}, {pipeline_mode = #tpu.pipeline_mode<synchronous>, transform_indices = @transform_3, window_bounds = array<i64: 64, 32>}, {pipeline_mode = #tpu.pipeline_mode<synchronous>, transform_indices = @transform_4, window_bounds = array<i64: 1, 32>}, {transform_indices = @transform_5, window_bounds = array<i64: 16, 32>}]} {
    %c0 = arith.constant 0 : index
    %c0_0 = arith.constant 0 : index
    %0 = vector.load %arg1[%c0, %c0_0] : memref<16x32xf32, #tpu.memory_space<vmem>>, vector<16x32xf32>
    %c0_1 = arith.constant 0 : index
    %c0_2 = arith.constant 0 : index
    %1 = vector.load %arg2[%c0_1, %c0_2] : memref<32x64xf32, #tpu.memory_space<vmem>>, vector<32x64xf32>
    %cst = arith.constant dense<0.000000e+00> : vector<16x64xf32>
    %2 = tpu.matmul %0, %1, %cst {dimension_numbers = #tpu.dot_dimension_numbers<[1], [0], [0], [1], [0, 0, 1, 1], [], []>} : vector<16x32xf32>, vector<32x64xf32>, vector<16x64xf32> -> vector<16x64xf32>
    %c0_3 = arith.constant 0 : index
    %c0_4 = arith.constant 0 : index
    %3 = vector.load %arg3[%c0_3, %c0_4] : memref<1x64xf32, #tpu.memory_space<vmem>>, vector<1x64xf32>
    %4 = vector.broadcast %3 : vector<1x64xf32> to vector<16x64xf32>
    %5 = arith.addf %2, %4 : vector<16x64xf32>
    %cst_5 = arith.constant 5.000000e-01 : f32
    %6 = vector.broadcast %cst_5 : f32 to vector<16x64xf32>
    %7 = arith.mulf %6, %5 : vector<16x64xf32>
    %cst_6 = arith.constant 0.707106769 : f32
    %8 = vector.broadcast %cst_6 : f32 to vector<16x64xf32>
    %9 = arith.mulf %5, %8 : vector<16x64xf32>
    %10 = math.absf %9 : vector<16x64xf32>
    %cst_7 = arith.constant 0.327591091 : f32
    %11 = vector.broadcast %cst_7 : f32 to vector<16x64xf32>
    %12 = arith.mulf %11, %10 : vector<16x64xf32>
    %cst_8 = arith.constant 1.000000e+00 : f32
    %13 = vector.broadcast %cst_8 : f32 to vector<16x64xf32>
    %14 = arith.addf %13, %12 : vector<16x64xf32>
    %cst_9 = arith.constant 1.000000e+00 : f32
    %15 = vector.broadcast %cst_9 : f32 to vector<16x64xf32>
    %16 = arith.divf %15, %14 : vector<16x64xf32>
    %cst_10 = arith.constant 1.06140542 : f32
    %17 = vector.broadcast %cst_10 : f32 to vector<16x64xf32>
    %18 = arith.mulf %17, %16 : vector<16x64xf32>
    %cst_11 = arith.constant -1.45315206 : f32
    %19 = vector.broadcast %cst_11 : f32 to vector<16x64xf32>
    %20 = arith.addf %18, %19 : vector<16x64xf32>
    %21 = arith.mulf %20, %16 : vector<16x64xf32>
    %cst_12 = arith.constant 1.42141378 : f32
    %22 = vector.broadcast %cst_12 : f32 to vector<16x64xf32>
    %23 = arith.addf %21, %22 : vector<16x64xf32>
    %24 = arith.mulf %23, %16 : vector<16x64xf32>
    %cst_13 = arith.constant -0.284496725 : f32
    %25 = vector.broadcast %cst_13 : f32 to vector<16x64xf32>
    %26 = arith.addf %24, %25 : vector<16x64xf32>
    %27 = arith.mulf %26, %16 : vector<16x64xf32>
    %cst_14 = arith.constant 0.254829586 : f32
    %28 = vector.broadcast %cst_14 : f32 to vector<16x64xf32>
    %29 = arith.addf %27, %28 : vector<16x64xf32>
    %30 = arith.mulf %29, %16 : vector<16x64xf32>
    %cst_15 = arith.constant 0.000000e+00 : f32
    %31 = vector.broadcast %cst_15 : f32 to vector<16x64xf32>
    %32 = arith.subf %31, %10 : vector<16x64xf32>
    %33 = arith.mulf %32, %10 : vector<16x64xf32>
    %34 = math.exp %33 : vector<16x64xf32>
    %35 = arith.mulf %30, %34 : vector<16x64xf32>
    %cst_16 = arith.constant 1.000000e+00 : f32
    %36 = vector.broadcast %cst_16 : f32 to vector<16x64xf32>
    %37 = arith.subf %36, %35 : vector<16x64xf32>
    %cst_17 = arith.constant 0.000000e+00 : f32
    %38 = vector.broadcast %cst_17 : f32 to vector<16x64xf32>
    %39 = arith.cmpf oge, %9, %38 : vector<16x64xf32>
    %cst_18 = arith.constant 0.000000e+00 : f32
    %40 = vector.broadcast %cst_18 : f32 to vector<16x64xf32>
    %41 = arith.subf %40, %37 : vector<16x64xf32>
    %42 = arith.select %39, %37, %41 : vector<16x64xi1>, vector<16x64xf32>
    %cst_19 = arith.constant 1.000000e+00 : f32
    %43 = vector.broadcast %cst_19 : f32 to vector<16x64xf32>
    %44 = arith.addf %43, %42 : vector<16x64xf32>
    %45 = arith.mulf %7, %44 : vector<16x64xf32>
    %c0_20 = arith.constant 0 : index
    %c0_21 = arith.constant 0 : index
    %46 = vector.load %arg4[%c0_20, %c0_21] : memref<64x32xf32, #tpu.memory_space<vmem>>, vector<64x32xf32>
    %cst_22 = arith.constant dense<0.000000e+00> : vector<16x32xf32>
    %47 = tpu.matmul %45, %46, %cst_22 {dimension_numbers = #tpu.dot_dimension_numbers<[1], [0], [0], [1], [0, 0, 1, 1], [], []>} : vector<16x64xf32>, vector<64x32xf32>, vector<16x32xf32> -> vector<16x32xf32>
    %c0_23 = arith.constant 0 : index
    %c0_24 = arith.constant 0 : index
    %48 = vector.load %arg5[%c0_23, %c0_24] : memref<1x32xf32, #tpu.memory_space<vmem>>, vector<1x32xf32>
    %49 = vector.broadcast %48 : vector<1x32xf32> to vector<16x32xf32>
    %50 = arith.addf %47, %49 : vector<16x32xf32>
    %c0_25 = arith.constant 0 : index
    %c0_26 = arith.constant 0 : index
    %51 = vector.load %arg6[%c0_25, %c0_26] : memref<16x32xf32, #tpu.memory_space<vmem>>, vector<16x32xf32>
    tpu.vector_store %arg6[%c0_25, %c0_26], %50 {strides = array<i32>} : memref<16x32xf32, #tpu.memory_space<vmem>>, vector<16x32xf32>,
    return
  }
  func.func @transform_0(%arg0: i32) -> (i32, i32) {
    %c0_i32 = arith.constant 0 : i32
    %c0_i32_0 = arith.constant 0 : i32
    return %arg0, %c0_i32 : i32, i32
  }
  func.func @transform_1(%arg0: i32) -> (i32, i32) {
    %c0_i32 = arith.constant 0 : i32
    %c0_i32_0 = arith.constant 0 : i32
    %c0_i32_1 = arith.constant 0 : i32
    return %c0_i32, %c0_i32_0 : i32, i32
  }
  func.func @transform_2(%arg0: i32) -> (i32, i32) {
    %c0_i32 = arith.constant 0 : i32
    %c0_i32_0 = arith.constant 0 : i32
    %c0_i32_1 = arith.constant 0 : i32
    return %c0_i32, %c0_i32_0 : i32, i32
  }
  func.func @transform_3(%arg0: i32) -> (i32, i32) {
    %c0_i32 = arith.constant 0 : i32
    %c0_i32_0 = arith.constant 0 : i32
    %c0_i32_1 = arith.constant 0 : i32
    return %c0_i32, %c0_i32_0 : i32, i32
  }
  func.func @transform_4(%arg0: i32) -> (i32, i32) {
    %c0_i32 = arith.constant 0 : i32
    %c0_i32_0 = arith.constant 0 : i32
    %c0_i32_1 = arith.constant 0 : i32
    return %c0_i32, %c0_i32_0 : i32, i32
  }
  func.func @transform_5(%arg0: i32) -> (i32, i32) {
    %c0_i32 = arith.constant 0 : i32
    %c0_i32_0 = arith.constant 0 : i32
    return %arg0, %c0_i32 : i32, i32
  }
}

</mosaic_0001>

<bundles_post_ra>
// kernel: tpu_custom_call.1
= control target key start
LH: loop header
LB: loop body
LE: loop exit
PB: predicated region body
PF: predicated region fallthrough
CT: control target
= control target key end

     0   :  { %vm34_vm0 = vcmask 261120   ;;  %s458_s0 = inlined_call_operand.vmem [shape: f32[16,32], index: 0, kind: input, shape index: {}]   ;;  %s459_s1 = inlined_call_operand.vmem [shape: f32[32,64], index: 1, kind: input, shape index: {}]   ;;  %s460_s2 = inlined_call_operand.vmem [shape: f32[1,64], index: 2, kind: input, shape index: {}]   ;;  %s461_s3 = inlined_call_operand.vmem [shape: f32[64,32], index: 3, kind: input, shape index: {}]   ;;  %s462_s4 = inlined_call_operand.vmem [shape: f32[1,32], index: 4, kind: input, shape index: {}]   ;;  %s463_s5 = inlined_call_operand.hbm [shape: f32[16,32], index: 5, kind: output, shape index: {}]  }
   0x1   :  { %v26_v0 = vld [vmem:[%s459_s1 + $0x18] sm:$0xff]  ;;  %v25_v1 = vld [vmem:[%s459_s1 + $0x10] sm:$0xff]  ;;  %v21_v2 = vld [vmem:[%s458_s0] sm:$0xff] }
   0x2   :  { %307 = vmatprep.subr.mxu0 %v26_v0  ;;  %v24_v3 = vld [vmem:[%s459_s1 + $0x8] sm:$0xff]  ;;  %315 = vmatprep.mubr.msk.f32.mxu0 %vm34_vm0, %v21_v2 }
   0x3   :  { %308 = vmatpush3.msra.mxu0 %v26_v0 }
   0x4   :  { %10 = vsyncpa [#allocation3], 0  ;;  %309 = vmatprep.subr.mxu0 %v25_v1  ;;  %v23_v4 = vld [vmem:[%s459_s1] sm:$0xff]  ;;  %v22_v5 = vld [vmem:[%s458_s0 + $0x8] sm:$0xff]  ;;  %vm185_vm3 = vcmask 523264   ;;  %s370_s21 = smov [#allocation2]  }
   0x5   :  { %310 = vmatpush3.msra.mxu0 %v25_v1  ;;  %v177_v6 = vld [vmem:[%s461_s3 + $0x38] sm:$0xff]  ;;  %v176_v7 = vld [vmem:[%s461_s3 + $0x30] sm:$0xff]  ;;  %v175_v8 = vld [vmem:[%s461_s3 + $0x28] sm:$0xff]  ;;  %s274_s22 = sshll.u32 %s370_s21, 4  ;;  %s275_s22 = int_to_ptr.vmem [resolvable:$true] %s274_s22 }
   0x6   :  { %311 = vmatprep.subr.mxu0 %v24_v3  ;;  %318 = vmatprep.subr.mxu1 %v177_v6  ;;  %v174_v9 = vld [vmem:[%s461_s3 + $0x20] sm:$0xff]  ;;  %v173_v10 = vld [vmem:[%s461_s3 + $0x18] sm:$0xff]  ;;  %v172_v11 = vld [vmem:[%s461_s3 + $0x10] sm:$0xff]  ;;  %s348_s23 = scalar_lea.vmem %s275_s22, 256  ;;  %p353_p1 = scmp.lt.s32.totalorder %s275_s22, %s275_s22 }
   0x7   :  { %312 = vmatpush3.msra.mxu0 %v24_v3  ;;  %319 = vmatpush3.msra.mxu1 %v177_v6  ;;  %v171_v12 = vld [vmem:[%s461_s3 + $0x8] sm:$0xff]  ;;  %v170_v13 = vld [vmem:[%s461_s3] sm:$0xff]  ;;  %p349_p0 = scmp.ne.s32.totalorder %s275_s22, %s348_s23  ;;  %p354_p2 = scmp.lt.s32.totalorder %s348_s23, %s348_s23 }
   0x8   :  { %313 = vmatprep.subr.mxu0 %v23_v4  ;;  %320 = vmatprep.subr.mxu1 %v176_v7  ;;  %v285_v14 = vld [vmem:[%s460_s2] ss:$0 sm:$0xff] }
   0x9   :  { %314 = vmatpush3.msra.mxu0 %v23_v4  ;;  %321 = vmatpush3.msra.mxu1 %v176_v7  ;;  %p355_p3 = por %p354_p2, %p353_p1 }
   0xa   :  { %316 = vmatmul.mubr.msk.f32.vlgmr.msra.gmra.mxu0 %vm34_vm0, %v22_v5  ;;  %322 = vmatprep.subr.mxu1 %v175_v8  ;;  %v288_v5 = vld [vmem:[%s462_s4] ss:$0 sm:$0xff] }
   0xb   :  { %323 = vmatpush3.msra.mxu1 %v175_v8  ;;  %p356_p4 = pnand %p355_p3, %p349_p0 }
   0xc   :  { %324 = vmatprep.subr.mxu1 %v174_v9 }
   0xd   :  { %325 = vmatpush3.msra.mxu1 %v174_v9 }
   0xe   :  { %326 = vmatprep.subr.mxu1 %v173_v10 }
   0xf   :  { %327 = vmatpush3.msra.mxu1 %v173_v10 }
  0x10   :  { %328 = vmatprep.subr.mxu1 %v172_v11 }
  0x11   :  { %329 = vmatpush3.msra.mxu1 %v172_v11 }
  0x12   :  { %330 = vmatprep.subr.mxu1 %v171_v12 }
  0x13   :  { %331 = vmatpush3.msra.mxu1 %v171_v12 }
  0x14   :  { %332 = vmatprep.subr.mxu1 %v170_v13 }
  0x15   :  { %333 = vmatpush3.msra.mxu1 %v170_v13 }
  0xca   :  { %v317_v15 = vpop.f32.mrf.mxu0 }
  0xcb   :  { %v113_v16 = vadd.f32 %v317_v15, %v285_v14 }
  0xcc   :  { %v107_v17 = vpop.f32.mrf.mxu0 }
  0xcd   :  { %v119_v18 = vmul.f32 0.70710677, %v113_v16  ;;  %v108_v19 = vadd.f32 %v285_v14, %v107_v17  ;;  %v117_v2 = vmul.f32 0.5, %v113_v16 }
  0xcf   :  { %v121_v20 = vand.u32 2147483647, %v119_v18  ;;  %v118_v21 = vmul.f32 0.70710677, %v108_v19  ;;  %vm161_vm1 = vcmp.ge.f32.partialorder %v119_v18, 0.0  ;;  %v116_v0 = vmul.f32 0.5, %v108_v19 }
  0xd1   :  { %v123_v22 = vmul.f32 0.3275911, %v121_v20  ;;  %v120_v23 = vand.u32 2147483647, %v118_v21  ;;  %v149_v27 = vsub.f32 0.0, %v121_v20  ;;  %vm160_vm2 = vcmp.ge.f32.partialorder %v118_v21, 0.0 }
  0xd3   :  { %v125_v24 = vadd.f32 1.0, %v123_v22  ;;  %v122_v25 = vmul.f32 0.3275911, %v120_v23  ;;  %v148_v28 = vsub.f32 0.0, %v120_v23  ;;  %v151_v29 = vmul.f32 %v149_v27, %v121_v20 }
  0xd5   :  { %340 = vrcp.f32 %v125_v24  ;;  %v124_v26 = vadd.f32 1.0, %v122_v25  ;;  %v150_v31 = vmul.f32 %v148_v28, %v120_v23  ;;  %v154_v33 = vmul.f32 1.442695, %v151_v29 }
  0xd7   :  { %342 = vrcp.f32 %v124_v26  ;;  %v152_v36 = vmul.f32 1.442695, %v150_v31 }
  0xd8   :  { %344 = vpow2.f32 %v154_v33 }
  0xd9   :  { %346 = vpow2.f32 %v152_v36 }
  0xe2   :  { %v341_v30 = vpop.eup %340 }
  0xe3   :  { %v131_v32 = vmul.f32 1.0614054, %v341_v30 }
  0xe4   :  { %v343_v34 = vpop.eup %342 }
  0xe5   :  { %v133_v35 = vadd.f32 -1.4531521, %v131_v32  ;;  %v130_v37 = vmul.f32 1.0614054, %v343_v34  ;;  %v345_v51 = vpop.eup %344 }
  0xe6   :  { %v347_v55 = vpop.eup %346 }
  0xe7   :  { %v135_v38 = vmul.f32 %v341_v30, %v133_v35  ;;  %v132_v39 = vadd.f32 -1.4531521, %v130_v37 }
  0xe9   :  { %v137_v40 = vadd.f32 1.4214138, %v135_v38  ;;  %v134_v41 = vmul.f32 %v343_v34, %v132_v39 }
  0xeb   :  { %v139_v42 = vmul.f32 %v341_v30, %v137_v40  ;;  %v136_v43 = vadd.f32 1.4214138, %v134_v41 }
  0xed   :  { %v141_v44 = vadd.f32 -0.28449672, %v139_v42  ;;  %v138_v45 = vmul.f32 %v343_v34, %v136_v43 }
  0xef   :  { %v143_v46 = vmul.f32 %v341_v30, %v141_v44  ;;  %v140_v47 = vadd.f32 -0.28449672, %v138_v45 }
  0xf1   :  { %v145_v48 = vadd.f32 0.2548296, %v143_v46  ;;  %v142_v49 = vmul.f32 %v343_v34, %v140_v47 }
  0xf3   :  { %v147_v50 = vmul.f32 %v341_v30, %v145_v48  ;;  %v144_v52 = vadd.f32 0.2548296, %v142_v49 }
  0xf5   :  { %v157_v53 = vmul.f32 %v345_v51, %v147_v50  ;;  %v146_v54 = vmul.f32 %v343_v34, %v144_v52 }
  0xf7   :  { %v159_v56 = vsub.f32 1.0, %v157_v53  ;;  %v156_v57 = vmul.f32 %v347_v55, %v146_v54 }
  0xf9   :  { %v163_v58 = vsub.f32 0.0, %v159_v56  ;;  %v158_v59 = vsub.f32 1.0, %v156_v57 }
  0xfb   :  { %v165_v60 = vsel %vm161_vm1, %v159_v56, %v163_v58  ;;  %v162_v61 = vsub.f32 0.0, %v158_v59 }
  0xfc   :  { %v167_v62 = vadd.f32 1.0, %v165_v60 }
  0xfd   :  { %v164_v63 = vsel %vm160_vm2, %v158_v59, %v162_v61 }
  0xfe   :  { %v166_v1 = vadd.f32 1.0, %v164_v63  ;;  %v169_v4 = vmul.f32 %v167_v62, %v117_v2 }
 0x100   :  { %v168_v3 = vmul.f32 %v166_v1, %v116_v0 }
 0x102   :  { %334 = vmatprep.mubr.msk.f32.mxu1 %vm185_vm3, %v168_v3 }
 0x103   :  { %335 = vmatmul.mubr.msk.f32.vlgmr.msra.gmra.mxu1 %vm185_vm3, %v169_v4 }
 0x1c3   :  { %v336_v6 = vpop.f32.mrf.mxu1 }
 0x1c4   :  { %v264_v7 = vadd.f32 %v336_v6, %v288_v5 }
 0x1c5   :  { %v258_v8 = vpop.f32.mrf.mxu1 }
 0x1c6   :  { %268 = vst.msk [vmem:[#allocation2 + $0x8] sm:$0xff] %vm34_vm0, %v264_v7  ;;  %v259_v9 = vadd.f32 %v288_v5, %v258_v8 }
 0x1c8   :  { %267 = vst.msk [vmem:[#allocation2] sm:$0xff] %vm34_vm0, %v259_v9 }
 0x1c9   :  { %359 = shalt.err (!%p356_p4)
}
 0x1ca   :  { %s371_s24 = smov 128   ;;  %s372_s4 = smov 8  }
 0x1cb   :  { %280 = dma.vmem_to_hbm [thread:$0]  %s275_s22, 256, %s463_s5, [#allocation3], %s371_s24, %s371_s24, %s372_s4  }
 0x1cc   :  { %368 = dma.done.wait [#allocation3], 256  }
 0x1cd   :  { %369 = vsyncadd [#allocation3], 4294967040 }
 0x1ce   :  { %284 = vsyncpa [#allocation3], 1 }

</bundles_post_ra>
